<compile_context>
chip_gen: v6e
topology: v6e:2x2x1
jax: 0.10.0
libtpu: 0.0.40
codegen_flags: <defaults>
</compile_context>

<pallas_src>
import math
import functools

import jax
import jax.numpy as jnp
from jax import lax
from jax.experimental import pallas as pl
from jax.experimental.pallas import tpu as pltpu


# ---------------------------------------------------------------------------
# Parameter / buffer construction (deterministic, mirrors nn.Module.__init__)
# ---------------------------------------------------------------------------
def make_positional_encoding_table(d_model: int, max_len: int = 128) -> jnp.ndarray:
    """Builds the `pe` buffer exactly like the PyTorch __init__."""
    assert d_model % 2 == 0, "d_model must be even (same implicit assumption as PyTorch module)"
    position = jnp.arange(max_len, dtype=jnp.float32)[:, None]               # [max_len, 1]
    div_term = jnp.exp(
        jnp.arange(0, d_model, 2, dtype=jnp.float32) * (-math.log(10000.0) / d_model)
    )                                                                          # [d_model//2]
    sin = jnp.sin(position * div_term)                                        # [max_len, d//2]
    cos = jnp.cos(position * div_term)                                        # [max_len, d//2]
    # interleave: pe[:, 0::2] = sin, pe[:, 1::2] = cos
    pe = jnp.stack([sin, cos], axis=-1).reshape(max_len, d_model)
    return pe.astype(jnp.float32)


# ---------------------------------------------------------------------------
# Portable counter-based hash (murmur3 fmix32) on int32.
# Logical right shifts are emulated with arithmetic shift + mask so everything
# stays in signed int32 (no unsigned-dtype lowering risk on Mosaic).
# ---------------------------------------------------------------------------
_GOLDEN_I32 = 0x9E3779B9 - (1 << 32)   # -1640531527
_FMIX_M1    = 0x85EBCA6B - (1 << 32)   # -2048144789
_FMIX_M2    = 0xC2B2AE35 - (1 << 32)   # -1028477387


def _fmix32(h):
    h = h ^ ((h >> 16) & 0xFFFF)
    h = h * _FMIX_M1
    h = h ^ ((h >> 13) & 0x7FFFF)
    h = h * _FMIX_M2
    h = h ^ ((h >> 16) & 0xFFFF)
    return h


# ---------------------------------------------------------------------------
# Pallas kernels (flattened layout: x block (T, S*D), pe block (T, S*D))
# ---------------------------------------------------------------------------
def _pe_add_kernel(x_ref, pe_ref, o_ref):
    """Eval-mode forward: out = x + pe[:seq_len]  (dropout is identity)."""
    o_ref[...] = x_ref[...] + pe_ref[...]           # plain vreg-aligned add


def _pe_add_dropout_kernel(seed_ref, x_ref, pe_ref, o_ref, *,
                           p: float, block_rows: int, row_elems: int):
    """Training-mode forward: out = dropout(x + pe[:seq_len], p).

    Dropout mask = counter-based hash of the global element index, so the
    pattern is deterministic per seed and identical for any block/grid choice.
    """
    y = x_ref[...] + pe_ref[...]
    shape = (block_rows, row_elems)

    row0 = pl.program_id(0) * block_rows
    rows_i = lax.broadcasted_iota(jnp.int32, shape, 0) + row0
    cols_i = lax.broadcasted_iota(jnp.int32, shape, 1)
    idx = rows_i * row_elems + cols_i               # global element index (wraps OK)

    h = _fmix32(idx + seed_ref[0] * _GOLDEN_I32)
    bits31 = h & 0x7FFFFFFF                         # uniform in [0, 2^31)

    # Integer-domain threshold: P(bits31 < thresh) = thresh / 2^31 ~= p.
    thresh = min(int(round(p * (1 << 31))), (1 << 31) - 1)
    keep = bits31 >= thresh
    scale = 1.0 / (1.0 - p)
    o_ref[...] = jnp.where(keep, y * scale, 0.0).astype(o_ref.dtype)


# ---------------------------------------------------------------------------
# Wrapper
# ---------------------------------------------------------------------------
def _pick_block_rows(rows: int, bytes_per_row: int, tile_target_bytes: int) -> int:
    """Row-block: full `rows` if it fits the byte target, else the largest
    multiple of 8 under the target (ragged last block handled by cdiv grid)."""
    cap_rows = max(1, tile_target_bytes // max(1, bytes_per_row))
    if rows <= cap_rows:
        return rows                                 # single block == full dim
    return max(8, (cap_rows // 8) * 8)


def positional_encoding_forward(
    x: jnp.ndarray,
    pe: jnp.ndarray,
    *,
    dropout_p: float = 0.1,
    training: bool = False,
    seed: int = 0,
    tile_target_bytes: int = 4 << 20,     # ~4 MiB x-tile; double-buffered in+out
                                          # (+ resident pe) stays under 32 MiB on
                                          # all generations incl. v7x (64 MiB VMEM)
    xla_fast_path_max_bytes: int = 0,     # >0: dispatch tiny inputs to plain XLA
) -> jnp.ndarray:
    """
    Args:
      x:  [batch, num_reads, seq_len, d_model]
      pe: [max_len, d_model], max_len >= seq_len
    Returns:
      [batch, num_reads, seq_len, d_model]
    """
    B, R, S, D = x.shape
    assert pe.shape[1] == D and pe.shape[0] >= S
    assert 0.0 <= dropout_p < 1.0, "dropout_p must be in [0, 1)"

    itemsize = x.dtype.itemsize
    total_bytes = x.size * itemsize

    # Optional tiny-input fast path (fixed pallas_call cost dominates below a
    # few hundred KiB). Disabled by default; dropout pattern differs from the
    # kernel path (uses jax.random instead of the in-kernel hash).
    if 0 < total_bytes <= xla_fast_path_max_bytes:
        y = x + pe[:S].astype(x.dtype)[None, None, :, :]
        if training and dropout_p > 0.0:
            keep = jax.random.bernoulli(jax.random.PRNGKey(seed), 1.0 - dropout_p, y.shape)
            y = jnp.where(keep, y / (1.0 - dropout_p), 0.0).astype(x.dtype)
        return y

    rows = B * R
    row_elems = S * D                               # lane-dense last axis
    x_flat = x.reshape(rows, row_elems)

    bytes_per_row = row_elems * itemsize
    T = _pick_block_rows(rows, bytes_per_row, tile_target_bytes)
    grid = (pl.cdiv(rows, T),)                      # ragged last block is masked

    # pe pre-broadcast to the full block so the in-kernel add needs no sublane
    # broadcast; constant index_map -> DMA'd once, VMEM-resident across steps.
    # NOTE: pe is cast to x.dtype before the add; for bf16 activations this is
    # a tiny deviation from PyTorch (which would promote the add to f32).
    pe_block = jnp.broadcast_to(
        pe[:S].reshape(1, row_elems).astype(x.dtype), (T, row_elems)
    )

    out_shape = jax.ShapeDtypeStruct((rows, row_elems), x.dtype)
    compiler_params = pltpu.CompilerParams(
        # Independent row blocks -> megacore-shardable. On v7x consider
        # pltpu.CORE_PARALLEL to explicitly split the stream across both TCs.
        dimension_semantics=("parallel",),
        vmem_limit_bytes=32 << 20,
    )

    if training and dropout_p > 0.0:
        kernel = functools.partial(
            _pe_add_dropout_kernel,
            p=float(dropout_p), block_rows=T, row_elems=row_elems,
        )
        out = pl.pallas_call(
            kernel,
            out_shape=out_shape,
            grid_spec=pltpu.PrefetchScalarGridSpec(
                num_scalar_prefetch=1,
                grid=grid,
                in_specs=[
                    pl.BlockSpec((T, row_elems), lambda i, seed_ref: (i, 0)),
                    pl.BlockSpec((T, row_elems), lambda i, seed_ref: (0, 0)),
                ],
                out_specs=pl.BlockSpec((T, row_elems), lambda i, seed_ref: (i, 0)),
            ),
            compiler_params=compiler_params,
        )(jnp.array([seed], dtype=jnp.int32), x_flat, pe_block)
    else:
        out = pl.pallas_call(
            _pe_add_kernel,
            out_shape=out_shape,
            grid=grid,
            in_specs=[
                pl.BlockSpec((T, row_elems), lambda i: (i, 0)),
                pl.BlockSpec((T, row_elems), lambda i: (0, 0)),
            ],
            out_specs=pl.BlockSpec((T, row_elems), lambda i: (i, 0)),
            compiler_params=compiler_params,
        )(x_flat, pe_block)

    return out.reshape(B, R, S, D)


# ---------------------------------------------------------------------------
# Main
# ---------------------------------------------------------------------------
if __name__ == "__main__":
    # x: [batch_size, num_reads, seq_len, embedding_dim]
    B, R, S, D = 2, 4, 8, 32
    MAX_LEN = 128
    DROPOUT_P = 0.1

    key = jax.random.PRNGKey(0)
    x = jax.random.normal(key, (B, R, S, D), dtype=jnp.float32)
    pe = make_positional_encoding_table(D, MAX_LEN)

    ref = x + pe[:S][None, None, :, :]

    # Eval-mode forward (dropout is identity), matching module.eval() semantics.
    out_eval = positional_encoding_forward(x, pe, dropout_p=DROPOUT_P, training=False)
    out_eval = jax.block_until_ready(out_eval)
    assert out_eval.shape == (B, R, S, D)
    assert jnp.allclose(out_eval, ref, atol=1e-6, rtol=1e-6), "eval mismatch vs reference"

    # Training-mode forward: kept elements must equal (x + pe) / (1 - p), others 0.
    out_tr = positional_encoding_forward(x, pe, dropout_p=DROPOUT_P, training=True, seed=1234)
    out_tr = jax.block_until_ready(out_tr)
    assert out_tr.shape == (B, R, S, D)
    # Test-only caveat: an element where x+pe == 0 exactly would be misread as
    # "dropped"; vanishingly unlikely with Gaussian inputs.
    kept = out_tr != 0.0
    scaled_ref = ref / (1.0 - DROPOUT_P)
    assert jnp.allclose(jnp.where(kept, out_tr, 0.0),
                        jnp.where(kept, scaled_ref, 0.0),
                        atol=1e-5, rtol=1e-5), "training kept-element mismatch"
    drop_frac = 1.0 - jnp.mean(kept.astype(jnp.float32))
    assert 0.0 <= float(drop_frac) <= 0.5, "dropout rate implausible"

    print("KERNEL_OK")
</pallas_src>

<mosaic_0001>
module attributes {stable_mosaic.version = 11 : i64} {
  func.func @_pe_add_kernel(%arg0: i32, %arg1: memref<8x256xf32, #tpu.memory_space<vmem>>, %arg2: memref<8x256xf32, #tpu.memory_space<vmem>>, %arg3: memref<8x256xf32, #tpu.memory_space<vmem>>) attributes {dimension_semantics = [#tpu.dimension_semantics<parallel>], iteration_bounds = array<i64: 1>, scalar_prefetch = 0 : i64, scratch_operands = 0 : i64, tpu.core_type = #tpu.core_type<tc>, window_params = [{transform_indices = @transform_0, window_bounds = array<i64: 8, 256>}, {pipeline_mode = #tpu.pipeline_mode<synchronous>, transform_indices = @transform_1, window_bounds = array<i64: 8, 256>}, {transform_indices = @transform_2, window_bounds = array<i64: 8, 256>}]} {
    %c0 = arith.constant 0 : index
    %c0_0 = arith.constant 0 : index
    %0 = vector.load %arg1[%c0, %c0_0] : memref<8x256xf32, #tpu.memory_space<vmem>>, vector<8x256xf32>
    %c0_1 = arith.constant 0 : index
    %c0_2 = arith.constant 0 : index
    %1 = vector.load %arg2[%c0_1, %c0_2] : memref<8x256xf32, #tpu.memory_space<vmem>>, vector<8x256xf32>
    %2 = arith.addf %0, %1 : vector<8x256xf32>
    %c0_3 = arith.constant 0 : index
    %c0_4 = arith.constant 0 : index
    %3 = vector.load %arg3[%c0_3, %c0_4] : memref<8x256xf32, #tpu.memory_space<vmem>>, vector<8x256xf32>
    tpu.vector_store %arg3[%c0_3, %c0_4], %2 {strides = array<i32>} : memref<8x256xf32, #tpu.memory_space<vmem>>, vector<8x256xf32>,
    return
  }
  func.func @transform_0(%arg0: i32) -> (i32, i32) {
    %c0_i32 = arith.constant 0 : i32
    %c0_i32_0 = arith.constant 0 : i32
    return %arg0, %c0_i32 : i32, i32
  }
  func.func @transform_1(%arg0: i32) -> (i32, i32) {
    %c0_i32 = arith.constant 0 : i32
    %c0_i32_0 = arith.constant 0 : i32
    %c0_i32_1 = arith.constant 0 : i32
    return %c0_i32, %c0_i32_0 : i32, i32
  }
  func.func @transform_2(%arg0: i32) -> (i32, i32) {
    %c0_i32 = arith.constant 0 : i32
    %c0_i32_0 = arith.constant 0 : i32
    return %arg0, %c0_i32 : i32, i32
  }
}

</mosaic_0001>

<bundles_post_ra>
// kernel: tpu_custom_call.1
= control target key start
LH: loop header
LB: loop body
LE: loop exit
PB: predicated region body
PF: predicated region fallthrough
CT: control target
= control target key end

     0   :  { %7 = vsyncpa [#allocation3], 0  ;;  %s156_s0 = inlined_call_operand.hbm [shape: f32[8,256], index: 0, kind: input, shape index: {}]   ;;  %s157_s1 = inlined_call_operand.hbm [shape: f32[8,256], index: 1, kind: input, shape index: {}]   ;;  %s158_s2 = inlined_call_operand.hbm [shape: f32[8,256], index: 2, kind: output, shape index: {}]  }
   0x1   :  { %8 = vsyncpa [#allocation6], 0 }
   0x2   :  { %9 = vsyncpa [#allocation4], 0  ;;  %s129_s9 = smov [#allocation2]   ;;  %s130_s11 = smov [#allocation5]  }
   0x3   :  { %s16_s10 = sshll.u32 %s129_s9, 4  ;;  %s26_s12 = sshll.u32 %s130_s11, 4  ;;  %s17_s10 = int_to_ptr.vmem [resolvable:$true] %s16_s10  ;;  %s27_s12 = int_to_ptr.vmem [resolvable:$true] %s26_s12 }
   0x4   :  { %s71_s13 = scalar_lea.vmem %s17_s10, 256  ;;  %p76_p1 = scmp.lt.s32.totalorder %s17_s10, %s17_s10 }
   0x5   :  { %p72_p0 = scmp.ne.s32.totalorder %s17_s10, %s71_s13  ;;  %p77_p2 = scmp.lt.s32.totalorder %s71_s13, %s71_s13 }
   0x7   :  { %p78_p3 = por %p77_p2, %p76_p1 }
   0x9   :  { %p79_p4 = pnand %p78_p3, %p72_p0 }
   0xb   :  { %82 = shalt.err (!%p79_p4)
}
   0xc   :  { %19 = dma.hbm_to_vmem [thread:$0]  %s156_s0, 256, %s17_s10, [#allocation3]  }
   0xd   :  { %s91_s16 = scalar_lea.vmem %s27_s12, 256  ;;  %p96_p6 = scmp.lt.s32.totalorder %s27_s12, %s27_s12 }
   0xe   :  { %p92_p5 = scmp.ne.s32.totalorder %s27_s12, %s91_s16  ;;  %p97_p7 = scmp.lt.s32.totalorder %s91_s16, %s91_s16 }
  0x10   :  { %p98_p8 = por %p97_p7, %p96_p6 }
  0x12   :  { %p99_p9 = pnand %p98_p8, %p92_p5 }
  0x14   :  { %102 = shalt.err (!%p99_p9)
}
  0x15   :  { %29 = dma.hbm_to_vmem [thread:$0]  %s157_s1, 256, %s27_s12, [#allocation6]  }
  0x16   :  { %123 = dma.done.wait [#allocation3], 256  }
  0x17   :  { %124 = vsyncadd [#allocation3], 4294967040 }
  0x18   :  { %125 = dma.done.wait [#allocation6], 256  }
  0x19   :  { %126 = vsyncadd [#allocation6], 4294967040  ;;  %s131_s19 = smov [#allocation7]   ;;  %v36_v0 = vld [vmem:[#allocation2] sm:$0xff]  ;;  %v38_v1 = vld [vmem:[#allocation5] sm:$0xff] }
  0x1a   :  { %s50_s20 = sshll.u32 %s131_s19, 4  ;;  %v37_v2 = vld [vmem:[#allocation2 + $0x8] sm:$0xff]  ;;  %v40_v3 = vadd.f32 %v38_v1, %v36_v0  ;;  %v39_v4 = vld [vmem:[#allocation5 + $0x8] sm:$0xff]  ;;  %s51_s20 = int_to_ptr.vmem [resolvable:$true] %s50_s20 }
  0x1b   :  { %v41_v5 = vadd.f32 %v39_v4, %v37_v2  ;;  %s103_s0 = scalar_lea.vmem %s51_s20, 256  ;;  %p108_p11 = scmp.lt.s32.totalorder %s51_s20, %s51_s20 }
  0x1c   :  { %42 = vst [vmem:[#allocation7] sm:$0xff] %v40_v3  ;;  %p104_p10 = scmp.ne.s32.totalorder %s51_s20, %s103_s0  ;;  %p109_p12 = scmp.lt.s32.totalorder %s103_s0, %s103_s0 }
  0x1d   :  { %43 = vst [vmem:[#allocation7 + $0x8] sm:$0xff] %v41_v5 }
  0x1e   :  { %p110_p13 = por %p109_p12, %p108_p11 }
  0x20   :  { %p111_p0 = pnand %p110_p13, %p104_p10 }
  0x22   :  { %114 = shalt.err (!%p111_p0)
}
  0x23   :  { %53 = dma.vmem_to_hbm [thread:$0]  %s51_s20, 256, %s158_s2, [#allocation4]  }
  0x24   :  { %127 = dma.done.wait [#allocation4], 256  }
  0x25   :  { %128 = vsyncadd [#allocation4], 4294967040 }
  0x26   :  { %57 = vsyncpa [#allocation3], 1 }
  0x27   :  { %58 = vsyncpa [#allocation6], 1 }
  0x28   :  { %59 = vsyncpa [#allocation4], 1 }

</bundles_post_ra>
